<compile_context>
chip_gen: v7x
topology: tpu7x:2x2x1
jax: 0.10.0
libtpu: 0.0.40
codegen_flags: <defaults>
</compile_context>

<pallas_src>
import math
from functools import partial

import jax
import jax.numpy as jnp
from jax import lax
from jax.experimental import pallas as pl
from jax.experimental.pallas import tpu as pltpu

# ---------------- model hyper-parameters (small, consistent with module) ----
S = 8        # sequence length
B = 2        # batch
D = 32       # d_model
H = 4        # nhead
DH = D // H  # head dim
DFF = 64     # dim_feedforward
EPS = 1e-5   # LayerNorm eps (PyTorch default)
NEG_INF = -1e30  # finite "minus infinity" for the cross-batch attention mask


def _layernorm(x, gamma, beta):
    # x: (R, D); gamma/beta: (1, D). Biased variance, like torch.nn.LayerNorm.
    mu = jnp.mean(x, axis=-1, keepdims=True)
    xc = x - mu
    var = jnp.mean(xc * xc, axis=-1, keepdims=True)
    return xc * lax.rsqrt(var + EPS) * gamma + beta


# ----------------------------- the fused kernel ------------------------------
def encoder_layer_kernel(x_ref, wA_ref, w2_ref, vec_ref, out_ref, *, batch):
    """Whole encoder layer in one invocation.

    x_ref  : (R, D), R = S*batch, rows in the natural contiguous order of the
             (S, B, D) input, i.e. row r <-> (seq = r // batch, b = r % batch).
    wA_ref : (D, 3D + D + DFF)  [w_in (Q cols pre-scaled) | w_out | w1], bf16.
    w2_ref : (DFF, D) bf16.
    vec_ref: (8, 3D) f32 rows: b_in (Q pre-scaled), b_out, g1, be1, g2, be2, b1, b2.
    """
    x = x_ref[...].astype(jnp.float32)                       # (R, D)
    cdt = wA_ref.dtype                                       # matmul operand dtype

    wA = wA_ref[...]
    w_in = wA[:, 0:3 * D]                                    # (D, 3D)
    w_out = wA[:, 3 * D:4 * D]                               # (D, D)
    w1 = wA[:, 4 * D:4 * D + DFF]                            # (D, DFF)
    w2 = w2_ref[...]                                         # (DFF, D)

    vecs = vec_ref[...]                                      # (8, 3D) f32
    b_in = vecs[0:1, 0:3 * D]
    b_out = vecs[1:2, 0:D]
    g1 = vecs[2:3, 0:D]
    be1 = vecs[3:4, 0:D]
    g2 = vecs[4:5, 0:D]
    be2 = vecs[5:6, 0:D]
    b1 = vecs[6:7, 0:DFF]
    b2 = vecs[7:8, 0:D]

    R = x.shape[0]

    # ---- norm1 -> fused QKV projection (1/sqrt(DH) already folded into W_q) --
    xn = _layernorm(x, g1, be1)
    qkv = jnp.dot(xn.astype(cdt), w_in,
                  preferred_element_type=jnp.float32) + b_in  # (R, 3D) f32

    # ---- attention jointly over all R rows, masking cross-batch pairs -------
    # (avoids any batch/head gather relayout; only lane slices + tiny matmuls)
    rid = lax.broadcasted_iota(jnp.int32, (R, R), 0)
    cid = lax.broadcasted_iota(jnp.int32, (R, R), 1)
    same_batch = (rid % batch) == (cid % batch)              # (R, R) bool
    # TODO(synk): optional attn_mask / key_padding_mask of nn.MultiheadAttention
    # are not implemented; the module's forward is exercised with None.

    nt_dims = (((1,), (1,)), ((), ()))                       # q @ k^T, no transpose op

    attn = jnp.zeros((R, D), jnp.float32)
    for h in range(H):
        q = qkv[:, h * DH:(h + 1) * DH]                      # (R, DH)
        k = qkv[:, D + h * DH:D + (h + 1) * DH]
        v = qkv[:, 2 * D + h * DH:2 * D + (h + 1) * DH]

        s = lax.dot_general(q.astype(cdt), k.astype(cdt), nt_dims,
                            preferred_element_type=jnp.float32)   # (R, R)
        s = jnp.where(same_batch, s, NEG_INF)
        s = s - jnp.max(s, axis=-1, keepdims=True)
        p = jnp.exp(s)                                       # masked entries -> exactly 0
        p = p / jnp.sum(p, axis=-1, keepdims=True)           # exact softmax (no approx recip)

        o = jnp.dot(p.astype(cdt), v.astype(cdt),
                    preferred_element_type=jnp.float32)      # (R, DH)
        # per-head out-projection accumulate == concat(heads) @ w_out, but with
        # no lane-concat relayout.
        attn = attn + jnp.dot(o.astype(cdt), w_out[h * DH:(h + 1) * DH, :],
                              preferred_element_type=jnp.float32)
    attn = attn + b_out

    # ---- residual 1, norm2, feed-forward (relu), residual 2 -----------------
    x1 = x + attn
    xn2 = _layernorm(x1, g2, be2)
    h1 = jnp.maximum(jnp.dot(xn2.astype(cdt), w1,
                             preferred_element_type=jnp.float32) + b1, 0.0)
    ff = jnp.dot(h1.astype(cdt), w2, preferred_element_type=jnp.float32) + b2

    # NOTE (v5e): D=32 < 128 lanes -> masked vst; acceptable at this size.
    out_ref[...] = (x1 + ff).astype(out_ref.dtype)


# -------------------- one-time parameter packing (hoisted) -------------------
def pack_params(params, compute_dtype=jnp.bfloat16):
    """Pack the 12 module tensors into 3 arrays. Call ONCE (not per forward).

    Folds the 1/sqrt(head_dim) attention scale into the Q columns of in_proj
    (weight and bias) and casts the two weight slabs to `compute_dtype`.
    """
    (w_in, b_in, w_out, b_out, g1, be1, g2, be2, w1, b1, w2, b2) = params

    scale = 1.0 / math.sqrt(DH)
    q_scale = jnp.concatenate(
        [jnp.full((1, D), scale, jnp.float32), jnp.ones((1, 2 * D), jnp.float32)],
        axis=1)                                               # (1, 3D)
    w_in_s = w_in * q_scale
    b_in_s = b_in * q_scale

    wA = jnp.concatenate([w_in_s, w_out, w1], axis=1).astype(compute_dtype)
    w2p = w2.astype(compute_dtype)

    width = 3 * D

    def pad_row(v):
        return jnp.pad(v, ((0, 0), (0, width - v.shape[1])))

    vecs = jnp.concatenate(
        [pad_row(b_in_s), pad_row(b_out), pad_row(g1), pad_row(be1),
         pad_row(g2), pad_row(be2), pad_row(b1), pad_row(b2)],
        axis=0).astype(jnp.float32)                           # (8, 3D)
    return wA, w2p, vecs


# --------------------------------- wrapper -----------------------------------
def transformer_encoder_postnorm_layer(src, wA, w2, vecs):
    """src: (S, B, D) float32; (wA, w2, vecs) from pack_params(). Returns (S, B, D)."""
    S_, B_, D_ = src.shape
    rows = S_ * B_
    x2d = src.reshape(rows, D_)          # contiguous relabel only, no transpose

    flops = (2 * rows * D_ * 3 * D_                            # QKV
             + H * (2 * rows * rows * DH * 2 + 2 * rows * DH * D_)  # attn + out-proj
             + 2 * rows * D_ * DFF + 2 * rows * DFF * D_)      # FFN
    trans = H * rows * rows + 2 * rows                         # exp + rsqrt
    bytes_accessed = (2 * rows * D_ * src.dtype.itemsize
                      + wA.size * wA.dtype.itemsize
                      + w2.size * w2.dtype.itemsize
                      + vecs.size * vecs.dtype.itemsize)

    out2d = pl.pallas_call(
        partial(encoder_layer_kernel, batch=B_),
        out_shape=jax.ShapeDtypeStruct((rows, D_), src.dtype),
        grid=(1,),                                   # single step: latency-bound size
        in_specs=[
            pl.BlockSpec((rows, D_), lambda i: (0, 0)),   # activations
            pl.BlockSpec(wA.shape, lambda i: (0, 0)),     # packed weight slab (bf16)
            pl.BlockSpec(w2.shape, lambda i: (0, 0)),     # linear2 weight (bf16)
            pl.BlockSpec(vecs.shape, lambda i: (0, 0)),   # packed biases / LN params
        ],
        out_specs=pl.BlockSpec((rows, D_), lambda i: (0, 0)),
        compiler_params=pltpu.CompilerParams(
            dimension_semantics=("arbitrary",)),
        cost_estimate=pl.CostEstimate(flops=flops, transcendentals=trans,
                                      bytes_accessed=bytes_accessed),
    )(x2d, wA, w2, vecs)

    return out2d.reshape(S_, B_, D_)


# ---------------- pure-JAX references for the correctness checks -------------
def reference_forward(src, params):
    """Exact f32 module semantics (PyTorch forward with masks=None, dropout=0)."""
    (w_in, b_in, w_out, b_out, g1, be1, g2, be2, w1, b1, w2, b2) = params
    fdot = partial(jnp.dot, precision=lax.Precision.HIGHEST)

    def ln(x, g, b):
        mu = jnp.mean(x, axis=-1, keepdims=True)
        var = jnp.mean((x - mu) ** 2, axis=-1, keepdims=True)
        return (x - mu) / jnp.sqrt(var + EPS) * g + b

    outs = []
    for bi in range(B):
        x = src[:, bi, :]
        xn = ln(x, g1, be1)
        qkv = fdot(xn, w_in) + b_in
        q, k, v = qkv[:, :D], qkv[:, D:2 * D], qkv[:, 2 * D:]
        heads = []
        for h in range(H):
            lo, hi = h * DH, (h + 1) * DH
            s = fdot(q[:, lo:hi] / math.sqrt(DH), k[:, lo:hi].T)
            p = jax.nn.softmax(s, axis=-1)
            heads.append(fdot(p, v[:, lo:hi]))
        attn = fdot(jnp.concatenate(heads, axis=-1), w_out) + b_out
        x = x + attn
        xn2 = ln(x, g2, be2)
        ff = fdot(jnp.maximum(fdot(xn2, w1) + b1, 0.0), w2) + b2
        outs.append(x + ff)
    return jnp.stack(outs, axis=1)


def reference_forward_packed(src, wA, w2, vecs):
    """Pure-JAX mirror of the kernel's math on the SAME packed/quantised params.

    Uses the straightforward per-batch, per-head formulation (no joint-row
    masking), so it independently validates the kernel's masked-attention trick
    and head handling.  Matmul operands are cast to the packed dtype with f32
    accumulation, exactly like the kernel.
    """
    cdt = wA.dtype
    w_in = wA[:, 0:3 * D]
    w_out = wA[:, 3 * D:4 * D]
    w1 = wA[:, 4 * D:4 * D + DFF]
    b_in = vecs[0:1, 0:3 * D]
    b_out = vecs[1:2, 0:D]
    g1, be1 = vecs[2:3, 0:D], vecs[3:4, 0:D]
    g2, be2 = vecs[4:5, 0:D], vecs[5:6, 0:D]
    b1, b2 = vecs[6:7, 0:DFF], vecs[7:8, 0:D]

    def ln(x, g, b):
        mu = jnp.mean(x, axis=-1, keepdims=True)
        var = jnp.mean((x - mu) ** 2, axis=-1, keepdims=True)
        return (x - mu) * lax.rsqrt(var + EPS) * g + b

    def mm(a, w):
        return jnp.dot(a.astype(cdt), w.astype(cdt),
                       preferred_element_type=jnp.float32)

    outs = []
    for bi in range(B):
        x = src[:, bi, :].astype(jnp.float32)
        xn = ln(x, g1, be1)
        qkv = mm(xn, w_in) + b_in                    # Q already pre-scaled
        q, k, v = qkv[:, :D], qkv[:, D:2 * D], qkv[:, 2 * D:]
        heads = []
        for h in range(H):
            lo, hi = h * DH, (h + 1) * DH
            s = mm(q[:, lo:hi], k[:, lo:hi].T)
            p = jax.nn.softmax(s, axis=-1)
            heads.append(mm(p, v[:, lo:hi]))
        attn = mm(jnp.concatenate(heads, axis=-1), w_out) + b_out
        x = x + attn
        xn2 = ln(x, g2, be2)
        ff = mm(jnp.maximum(mm(xn2, w1) + b1, 0.0), w2) + b2
        outs.append(x + ff)
    return jnp.stack(outs, axis=1)


# --------------------- deterministic synthetic parameters --------------------
def make_params(key):
    """PyTorch-shaped parameters, pre-transposed to (in, out) layout."""
    ks = jax.random.split(key, 8)

    def xavier(k, fan_in, fan_out, shape):
        bound = math.sqrt(6.0 / (fan_in + fan_out))
        return jax.random.uniform(k, shape, jnp.float32, -bound, bound)

    w_in = xavier(ks[0], D, 3 * D, (D, 3 * D))           # in_proj_weight^T
    b_in = jnp.zeros((1, 3 * D), jnp.float32) + 0.01
    w_out = xavier(ks[1], D, D, (D, D))                  # out_proj.weight^T
    b_out = jnp.zeros((1, D), jnp.float32) - 0.02
    g1 = jnp.ones((1, D), jnp.float32) * 1.1
    be1 = jnp.zeros((1, D), jnp.float32) + 0.05
    g2 = jnp.ones((1, D), jnp.float32) * 0.9
    be2 = jnp.zeros((1, D), jnp.float32) - 0.05
    w1 = xavier(ks[2], D, DFF, (D, DFF))                 # linear1.weight^T
    b1 = jax.random.uniform(ks[3], (1, DFF), jnp.float32, -0.1, 0.1)
    w2 = xavier(ks[4], DFF, D, (DFF, D))                 # linear2.weight^T
    b2 = jax.random.uniform(ks[5], (1, D), jnp.float32, -0.1, 0.1)
    return (w_in, b_in, w_out, b_out, g1, be1, g2, be2, w1, b1, w2, b2)


if __name__ == "__main__":
    key = jax.random.PRNGKey(0)
    k_src, k_par = jax.random.split(key)
    src = jax.random.normal(k_src, (S, B, D), jnp.float32)
    params = make_params(k_par)

    # One-time packing (hoisted out of the per-forward hot path).
    wA, w2p, vecs = pack_params(params, compute_dtype=jnp.bfloat16)

    fwd = jax.jit(transformer_encoder_postnorm_layer)
    out = jax.block_until_ready(fwd(src, wA, w2p, vecs))
    assert out.shape == (S, B, D)

    # (1) Kernel-logic check: compare against a pure-JAX mirror that uses the
    #     same packed bf16 parameters -> differences are only float noise.
    ref_packed = reference_forward_packed(src, wA, w2p, vecs)
    err_logic = float(jnp.max(jnp.abs(out - ref_packed)))
    assert err_logic < 5e-3, f"kernel vs packed-reference mismatch: {err_logic}"

    # (2) Accuracy vs exact f32 module semantics: the gap is the intentional
    #     bf16 matmul-operand quantisation (MXU throughput / halved weight DMA),
    #     typically ~1e-2 at these shapes.
    ref_exact = reference_forward(src, params)
    err_quant = float(jnp.max(jnp.abs(out - ref_exact)))
    assert err_quant < 6e-2, f"bf16 quantisation error too large: {err_quant}"

    print("KERNEL_OK")
</pallas_src>

<mosaic_0001>
module attributes {stable_mosaic.version = 11 : i64} {
  func.func @encoder_layer_kernel(%arg0: i32, %arg1: memref<16x32xf32, #tpu.memory_space<vmem>>, %arg2: memref<32x192xbf16, #tpu.memory_space<vmem>>, %arg3: memref<64x32xbf16, #tpu.memory_space<vmem>>, %arg4: memref<8x96xf32, #tpu.memory_space<vmem>>, %arg5: memref<16x32xf32, #tpu.memory_space<vmem>>) attributes {dimension_semantics = [#tpu.dimension_semantics<arbitrary>], iteration_bounds = array<i64: 1>, scalar_prefetch = 0 : i64, scratch_operands = 0 : i64, tpu.core_type = #tpu.core_type<tc>, window_params = [{pipeline_mode = #tpu.pipeline_mode<synchronous>, transform_indices = @transform_0, window_bounds = array<i64: 16, 32>}, {pipeline_mode = #tpu.pipeline_mode<synchronous>, transform_indices = @transform_1, window_bounds = array<i64: 32, 192>}, {pipeline_mode = #tpu.pipeline_mode<synchronous>, transform_indices = @transform_2, window_bounds = array<i64: 64, 32>}, {pipeline_mode = #tpu.pipeline_mode<synchronous>, transform_indices = @transform_3, window_bounds = array<i64: 8, 96>}, {pipeline_mode = #tpu.pipeline_mode<synchronous>, transform_indices = @transform_4, window_bounds = array<i64: 16, 32>}]} {
    %c0 = arith.constant 0 : index
    %c0_0 = arith.constant 0 : index
    %0 = vector.load %arg1[%c0, %c0_0] : memref<16x32xf32, #tpu.memory_space<vmem>>, vector<16x32xf32>
    %c0_1 = arith.constant 0 : index
    %c0_2 = arith.constant 0 : index
    %1 = vector.load %arg2[%c0_1, %c0_2] : memref<32x192xbf16, #tpu.memory_space<vmem>>, vector<32x192xbf16>
    %2 = vector.extract_strided_slice %1 {offsets = [0, 0], sizes = [32, 96], strides = [1, 1]} : vector<32x192xbf16> to vector<32x96xbf16>
    %3 = vector.extract_strided_slice %1 {offsets = [0, 96], sizes = [32, 32], strides = [1, 1]} : vector<32x192xbf16> to vector<32x32xbf16>
    %4 = vector.extract_strided_slice %1 {offsets = [0, 128], sizes = [32, 64], strides = [1, 1]} : vector<32x192xbf16> to vector<32x64xbf16>
    %c0_3 = arith.constant 0 : index
    %c0_4 = arith.constant 0 : index
    %5 = vector.load %arg3[%c0_3, %c0_4] : memref<64x32xbf16, #tpu.memory_space<vmem>>, vector<64x32xbf16>
    %c0_5 = arith.constant 0 : index
    %c0_6 = arith.constant 0 : index
    %6 = vector.load %arg4[%c0_5, %c0_6] : memref<8x96xf32, #tpu.memory_space<vmem>>, vector<8x96xf32>
    %7 = vector.extract_strided_slice %6 {offsets = [0, 0], sizes = [1, 96], strides = [1, 1]} : vector<8x96xf32> to vector<1x96xf32>
    %8 = vector.extract_strided_slice %6 {offsets = [1, 0], sizes = [1, 32], strides = [1, 1]} : vector<8x96xf32> to vector<1x32xf32>
    %9 = vector.extract_strided_slice %6 {offsets = [2, 0], sizes = [1, 32], strides = [1, 1]} : vector<8x96xf32> to vector<1x32xf32>
    %10 = vector.extract_strided_slice %6 {offsets = [3, 0], sizes = [1, 32], strides = [1, 1]} : vector<8x96xf32> to vector<1x32xf32>
    %11 = vector.extract_strided_slice %6 {offsets = [4, 0], sizes = [1, 32], strides = [1, 1]} : vector<8x96xf32> to vector<1x32xf32>
    %12 = vector.extract_strided_slice %6 {offsets = [5, 0], sizes = [1, 32], strides = [1, 1]} : vector<8x96xf32> to vector<1x32xf32>
    %13 = vector.extract_strided_slice %6 {offsets = [6, 0], sizes = [1, 64], strides = [1, 1]} : vector<8x96xf32> to vector<1x64xf32>
    %14 = vector.extract_strided_slice %6 {offsets = [7, 0], sizes = [1, 32], strides = [1, 1]} : vector<8x96xf32> to vector<1x32xf32>
    %cst = arith.constant dense<0.000000e+00> : vector<16xf32>
    %15 = vector.multi_reduction <add>, %0, %cst [1] : vector<16x32xf32> to vector<16xf32>
    %16 = vector.shape_cast %15 : vector<16xf32> to vector<16x1xf32>
    %cst_7 = arith.constant 3.200000e+01 : f32
    %17 = vector.broadcast %cst_7 : f32 to vector<16x1xf32>
    %18 = arith.divf %16, %17 : vector<16x1xf32>
    %19 = vector.broadcast %18 : vector<16x1xf32> to vector<16x32xf32>
    %20 = arith.subf %0, %19 : vector<16x32xf32>
    %21 = arith.mulf %20, %20 : vector<16x32xf32>
    %cst_8 = arith.constant dense<0.000000e+00> : vector<16xf32>
    %22 = vector.multi_reduction <add>, %21, %cst_8 [1] : vector<16x32xf32> to vector<16xf32>
    %23 = vector.shape_cast %22 : vector<16xf32> to vector<16x1xf32>
    %cst_9 = arith.constant 3.200000e+01 : f32
    %24 = vector.broadcast %cst_9 : f32 to vector<16x1xf32>
    %25 = arith.divf %23, %24 : vector<16x1xf32>
    %cst_10 = arith.constant 9.99999974E-6 : f32
    %26 = vector.broadcast %cst_10 : f32 to vector<16x1xf32>
    %27 = arith.addf %25, %26 : vector<16x1xf32>
    %28 = math.rsqrt %27 : vector<16x1xf32>
    %29 = vector.broadcast %28 : vector<16x1xf32> to vector<16x32xf32>
    %30 = arith.mulf %20, %29 : vector<16x32xf32>
    %31 = vector.broadcast %9 : vector<1x32xf32> to vector<16x32xf32>
    %32 = arith.mulf %30, %31 : vector<16x32xf32>
    %33 = vector.broadcast %10 : vector<1x32xf32> to vector<16x32xf32>
    %34 = arith.addf %32, %33 : vector<16x32xf32>
    %35 = arith.truncf %34 : vector<16x32xf32> to vector<16x32xbf16>
    %cst_11 = arith.constant dense<0.000000e+00> : vector<16x96xf32>
    %36 = tpu.matmul %35, %2, %cst_11 {dimension_numbers = #tpu.dot_dimension_numbers<[1], [0], [0], [1], [0, 0, 1, 1], [], []>} : vector<16x32xbf16>, vector<32x96xbf16>, vector<16x96xf32> -> vector<16x96xf32>
    %37 = vector.broadcast %7 : vector<1x96xf32> to vector<16x96xf32>
    %38 = arith.addf %36, %37 : vector<16x96xf32>
    %39 = tpu.iota {dimensions = array<i32: 0>} : vector<16x16xi32>
    %40 = tpu.iota {dimensions = array<i32: 1>} : vector<16x16xi32>
    %c2_i32 = arith.constant 2 : i32
    %c0_i32 = arith.constant 0 : i32
    %41 = arith.cmpi eq, %c2_i32, %c0_i32 : i32
    %c1_i32 = arith.constant 1 : i32
    %42 = arith.select %41, %c1_i32, %c2_i32 : i32
    %43 = vector.broadcast %42 : i32 to vector<16x16xi32>
    %44 = arith.remsi %39, %43 : vector<16x16xi32>
    %c0_i32_12 = arith.constant 0 : i32
    %45 = vector.broadcast %c0_i32_12 : i32 to vector<16x16xi32>
    %46 = arith.cmpi ne, %44, %45 : vector<16x16xi32>
    %c0_i32_13 = arith.constant 0 : i32
    %47 = vector.broadcast %c0_i32_13 : i32 to vector<16x16xi32>
    %48 = arith.cmpi slt, %44, %47 : vector<16x16xi32>
    %c0_i32_14 = arith.constant 0 : i32
    %49 = arith.cmpi slt, %42, %c0_i32_14 : i32
    %50 = vector.broadcast %49 : i1 to vector<16x16xi1>
    %51 = vector.broadcast %50 : vector<16x16xi1> to vector<16x16xi1>
    %52 = arith.xori %48, %51 : vector<16x16xi1>
    %53 = arith.andi %52, %46 : vector<16x16xi1>
    %54 = vector.broadcast %42 : i32 to vector<16x16xi32>
    %55 = arith.addi %44, %54 : vector<16x16xi32>
    %56 = arith.select %53, %55, %44 : vector<16x16xi1>, vector<16x16xi32>
    %c2_i32_15 = arith.constant 2 : i32
    %c0_i32_16 = arith.constant 0 : i32
    %57 = arith.cmpi eq, %c2_i32_15, %c0_i32_16 : i32
    %c1_i32_17 = arith.constant 1 : i32
    %58 = arith.select %57, %c1_i32_17, %c2_i32_15 : i32
    %59 = vector.broadcast %58 : i32 to vector<16x16xi32>
    %60 = arith.remsi %40, %59 : vector<16x16xi32>
    %c0_i32_18 = arith.constant 0 : i32
    %61 = vector.broadcast %c0_i32_18 : i32 to vector<16x16xi32>
    %62 = arith.cmpi ne, %60, %61 : vector<16x16xi32>
    %c0_i32_19 = arith.constant 0 : i32
    %63 = vector.broadcast %c0_i32_19 : i32 to vector<16x16xi32>
    %64 = arith.cmpi slt, %60, %63 : vector<16x16xi32>
    %c0_i32_20 = arith.constant 0 : i32
    %65 = arith.cmpi slt, %58, %c0_i32_20 : i32
    %66 = vector.broadcast %65 : i1 to vector<16x16xi1>
    %67 = vector.broadcast %66 : vector<16x16xi1> to vector<16x16xi1>
    %68 = arith.xori %64, %67 : vector<16x16xi1>
    %69 = arith.andi %68, %62 : vector<16x16xi1>
    %70 = vector.broadcast %58 : i32 to vector<16x16xi32>
    %71 = arith.addi %60, %70 : vector<16x16xi32>
    %72 = arith.select %69, %71, %60 : vector<16x16xi1>, vector<16x16xi32>
    %73 = arith.cmpi eq, %56, %72 : vector<16x16xi32>
    %cst_21 = arith.constant 0.000000e+00 : f32
    %74 = vector.broadcast %cst_21 : f32 to vector<16x32xf32>
    %75 = vector.extract_strided_slice %38 {offsets = [0, 0], sizes = [16, 8], strides = [1, 1]} : vector<16x96xf32> to vector<16x8xf32>
    %76 = vector.extract_strided_slice %38 {offsets = [0, 32], sizes = [16, 8], strides = [1, 1]} : vector<16x96xf32> to vector<16x8xf32>
    %77 = vector.extract_strided_slice %38 {offsets = [0, 64], sizes = [16, 8], strides = [1, 1]} : vector<16x96xf32> to vector<16x8xf32>
    %78 = arith.truncf %75 : vector<16x8xf32> to vector<16x8xbf16>
    %79 = arith.truncf %76 : vector<16x8xf32> to vector<16x8xbf16>
    %cst_22 = arith.constant dense<0.000000e+00> : vector<16x16xf32>
    %80 = tpu.matmul %78, %79, %cst_22 {dimension_numbers = #tpu.dot_dimension_numbers<[1], [1], [0], [0], [0, 0, 1, 0], [], []>} : vector<16x8xbf16>, vector<16x8xbf16>, vector<16x16xf32> -> vector<16x16xf32>
    %cst_23 = arith.constant -1.000000e+30 : f32
    %81 = vector.broadcast %cst_23 : f32 to vector<16x16xf32>
    %82 = arith.select %73, %80, %81 : vector<16x16xi1>, vector<16x16xf32>
    %cst_24 = arith.constant dense<0xFF800000> : vector<16xf32>
    %83 = vector.multi_reduction <maximumf>, %82, %cst_24 [1] : vector<16x16xf32> to vector<16xf32>
    %84 = vector.shape_cast %83 : vector<16xf32> to vector<16x1xf32>
    %85 = vector.broadcast %84 : vector<16x1xf32> to vector<16x16xf32>
    %86 = arith.subf %82, %85 : vector<16x16xf32>
    %87 = math.exp %86 : vector<16x16xf32>
    %cst_25 = arith.constant dense<0.000000e+00> : vector<16xf32>
    %88 = vector.multi_reduction <add>, %87, %cst_25 [1] : vector<16x16xf32> to vector<16xf32>
    %89 = vector.shape_cast %88 : vector<16xf32> to vector<16x1xf32>
    %90 = vector.broadcast %89 : vector<16x1xf32> to vector<16x16xf32>
    %91 = arith.divf %87, %90 : vector<16x16xf32>
    %92 = arith.truncf %91 : vector<16x16xf32> to vector<16x16xbf16>
    %93 = arith.truncf %77 : vector<16x8xf32> to vector<16x8xbf16>
    %cst_26 = arith.constant dense<0.000000e+00> : vector<16x8xf32>
    %94 = tpu.matmul %92, %93, %cst_26 {dimension_numbers = #tpu.dot_dimension_numbers<[1], [0], [0], [1], [0, 0, 1, 1], [], []>} : vector<16x16xbf16>, vector<16x8xbf16>, vector<16x8xf32> -> vector<16x8xf32>
    %95 = arith.truncf %94 : vector<16x8xf32> to vector<16x8xbf16>
    %96 = vector.extract_strided_slice %3 {offsets = [0, 0], sizes = [8, 32], strides = [1, 1]} : vector<32x32xbf16> to vector<8x32xbf16>
    %cst_27 = arith.constant dense<0.000000e+00> : vector<16x32xf32>
    %97 = tpu.matmul %95, %96, %cst_27 {dimension_numbers = #tpu.dot_dimension_numbers<[1], [0], [0], [1], [0, 0, 1, 1], [], []>} : vector<16x8xbf16>, vector<8x32xbf16>, vector<16x32xf32> -> vector<16x32xf32>
    %98 = arith.addf %74, %97 : vector<16x32xf32>
    %99 = vector.extract_strided_slice %38 {offsets = [0, 8], sizes = [16, 8], strides = [1, 1]} : vector<16x96xf32> to vector<16x8xf32>
    %100 = vector.extract_strided_slice %38 {offsets = [0, 40], sizes = [16, 8], strides = [1, 1]} : vector<16x96xf32> to vector<16x8xf32>
    %101 = vector.extract_strided_slice %38 {offsets = [0, 72], sizes = [16, 8], strides = [1, 1]} : vector<16x96xf32> to vector<16x8xf32>
    %102 = arith.truncf %99 : vector<16x8xf32> to vector<16x8xbf16>
    %103 = arith.truncf %100 : vector<16x8xf32> to vector<16x8xbf16>
    %cst_28 = arith.constant dense<0.000000e+00> : vector<16x16xf32>
    %104 = tpu.matmul %102, %103, %cst_28 {dimension_numbers = #tpu.dot_dimension_numbers<[1], [1], [0], [0], [0, 0, 1, 0], [], []>} : vector<16x8xbf16>, vector<16x8xbf16>, vector<16x16xf32> -> vector<16x16xf32>
    %cst_29 = arith.constant -1.000000e+30 : f32
    %105 = vector.broadcast %cst_29 : f32 to vector<16x16xf32>
    %106 = arith.select %73, %104, %105 : vector<16x16xi1>, vector<16x16xf32>
    %cst_30 = arith.constant dense<0xFF800000> : vector<16xf32>
    %107 = vector.multi_reduction <maximumf>, %106, %cst_30 [1] : vector<16x16xf32> to vector<16xf32>
    %108 = vector.shape_cast %107 : vector<16xf32> to vector<16x1xf32>
    %109 = vector.broadcast %108 : vector<16x1xf32> to vector<16x16xf32>
    %110 = arith.subf %106, %109 : vector<16x16xf32>
    %111 = math.exp %110 : vector<16x16xf32>
    %cst_31 = arith.constant dense<0.000000e+00> : vector<16xf32>
    %112 = vector.multi_reduction <add>, %111, %cst_31 [1] : vector<16x16xf32> to vector<16xf32>
    %113 = vector.shape_cast %112 : vector<16xf32> to vector<16x1xf32>
    %114 = vector.broadcast %113 : vector<16x1xf32> to vector<16x16xf32>
    %115 = arith.divf %111, %114 : vector<16x16xf32>
    %116 = arith.truncf %115 : vector<16x16xf32> to vector<16x16xbf16>
    %117 = arith.truncf %101 : vector<16x8xf32> to vector<16x8xbf16>
    %cst_32 = arith.constant dense<0.000000e+00> : vector<16x8xf32>
    %118 = tpu.matmul %116, %117, %cst_32 {dimension_numbers = #tpu.dot_dimension_numbers<[1], [0], [0], [1], [0, 0, 1, 1], [], []>} : vector<16x16xbf16>, vector<16x8xbf16>, vector<16x8xf32> -> vector<16x8xf32>
    %119 = arith.truncf %118 : vector<16x8xf32> to vector<16x8xbf16>
    %120 = vector.extract_strided_slice %3 {offsets = [8, 0], sizes = [8, 32], strides = [1, 1]} : vector<32x32xbf16> to vector<8x32xbf16>
    %cst_33 = arith.constant dense<0.000000e+00> : vector<16x32xf32>
    %121 = tpu.matmul %119, %120, %cst_33 {dimension_numbers = #tpu.dot_dimension_numbers<[1], [0], [0], [1], [0, 0, 1, 1], [], []>} : vector<16x8xbf16>, vector<8x32xbf16>, vector<16x32xf32> -> vector<16x32xf32>
    %122 = arith.addf %98, %121 : vector<16x32xf32>
    %123 = vector.extract_strided_slice %38 {offsets = [0, 16], sizes = [16, 8], strides = [1, 1]} : vector<16x96xf32> to vector<16x8xf32>
    %124 = vector.extract_strided_slice %38 {offsets = [0, 48], sizes = [16, 8], strides = [1, 1]} : vector<16x96xf32> to vector<16x8xf32>
    %125 = vector.extract_strided_slice %38 {offsets = [0, 80], sizes = [16, 8], strides = [1, 1]} : vector<16x96xf32> to vector<16x8xf32>
    %126 = arith.truncf %123 : vector<16x8xf32> to vector<16x8xbf16>
    %127 = arith.truncf %124 : vector<16x8xf32> to vector<16x8xbf16>
    %cst_34 = arith.constant dense<0.000000e+00> : vector<16x16xf32>
    %128 = tpu.matmul %126, %127, %cst_34 {dimension_numbers = #tpu.dot_dimension_numbers<[1], [1], [0], [0], [0, 0, 1, 0], [], []>} : vector<16x8xbf16>, vector<16x8xbf16>, vector<16x16xf32> -> vector<16x16xf32>
    %cst_35 = arith.constant -1.000000e+30 : f32
    %129 = vector.broadcast %cst_35 : f32 to vector<16x16xf32>
    %130 = arith.select %73, %128, %129 : vector<16x16xi1>, vector<16x16xf32>
    %cst_36 = arith.constant dense<0xFF800000> : vector<16xf32>
    %131 = vector.multi_reduction <maximumf>, %130, %cst_36 [1] : vector<16x16xf32> to vector<16xf32>
    %132 = vector.shape_cast %131 : vector<16xf32> to vector<16x1xf32>
    %133 = vector.broadcast %132 : vector<16x1xf32> to vector<16x16xf32>
    %134 = arith.subf %130, %133 : vector<16x16xf32>
    %135 = math.exp %134 : vector<16x16xf32>
    %cst_37 = arith.constant dense<0.000000e+00> : vector<16xf32>
    %136 = vector.multi_reduction <add>, %135, %cst_37 [1] : vector<16x16xf32> to vector<16xf32>
    %137 = vector.shape_cast %136 : vector<16xf32> to vector<16x1xf32>
    %138 = vector.broadcast %137 : vector<16x1xf32> to vector<16x16xf32>
    %139 = arith.divf %135, %138 : vector<16x16xf32>
    %140 = arith.truncf %139 : vector<16x16xf32> to vector<16x16xbf16>
    %141 = arith.truncf %125 : vector<16x8xf32> to vector<16x8xbf16>
    %cst_38 = arith.constant dense<0.000000e+00> : vector<16x8xf32>
    %142 = tpu.matmul %140, %141, %cst_38 {dimension_numbers = #tpu.dot_dimension_numbers<[1], [0], [0], [1], [0, 0, 1, 1], [], []>} : vector<16x16xbf16>, vector<16x8xbf16>, vector<16x8xf32> -> vector<16x8xf32>
    %143 = arith.truncf %142 : vector<16x8xf32> to vector<16x8xbf16>
    %144 = vector.extract_strided_slice %3 {offsets = [16, 0], sizes = [8, 32], strides = [1, 1]} : vector<32x32xbf16> to vector<8x32xbf16>
    %cst_39 = arith.constant dense<0.000000e+00> : vector<16x32xf32>
    %145 = tpu.matmul %143, %144, %cst_39 {dimension_numbers = #tpu.dot_dimension_numbers<[1], [0], [0], [1], [0, 0, 1, 1], [], []>} : vector<16x8xbf16>, vector<8x32xbf16>, vector<16x32xf32> -> vector<16x32xf32>
    %146 = arith.addf %122, %145 : vector<16x32xf32>
    %147 = vector.extract_strided_slice %38 {offsets = [0, 24], sizes = [16, 8], strides = [1, 1]} : vector<16x96xf32> to vector<16x8xf32>
    %148 = vector.extract_strided_slice %38 {offsets = [0, 56], sizes = [16, 8], strides = [1, 1]} : vector<16x96xf32> to vector<16x8xf32>
    %149 = vector.extract_strided_slice %38 {offsets = [0, 88], sizes = [16, 8], strides = [1, 1]} : vector<16x96xf32> to vector<16x8xf32>
    %150 = arith.truncf %147 : vector<16x8xf32> to vector<16x8xbf16>
    %151 = arith.truncf %148 : vector<16x8xf32> to vector<16x8xbf16>
    %cst_40 = arith.constant dense<0.000000e+00> : vector<16x16xf32>
    %152 = tpu.matmul %150, %151, %cst_40 {dimension_numbers = #tpu.dot_dimension_numbers<[1], [1], [0], [0], [0, 0, 1, 0], [], []>} : vector<16x8xbf16>, vector<16x8xbf16>, vector<16x16xf32> -> vector<16x16xf32>
    %cst_41 = arith.constant -1.000000e+30 : f32
    %153 = vector.broadcast %cst_41 : f32 to vector<16x16xf32>
    %154 = arith.select %73, %152, %153 : vector<16x16xi1>, vector<16x16xf32>
    %cst_42 = arith.constant dense<0xFF800000> : vector<16xf32>
    %155 = vector.multi_reduction <maximumf>, %154, %cst_42 [1] : vector<16x16xf32> to vector<16xf32>
    %156 = vector.shape_cast %155 : vector<16xf32> to vector<16x1xf32>
    %157 = vector.broadcast %156 : vector<16x1xf32> to vector<16x16xf32>
    %158 = arith.subf %154, %157 : vector<16x16xf32>
    %159 = math.exp %158 : vector<16x16xf32>
    %cst_43 = arith.constant dense<0.000000e+00> : vector<16xf32>
    %160 = vector.multi_reduction <add>, %159, %cst_43 [1] : vector<16x16xf32> to vector<16xf32>
    %161 = vector.shape_cast %160 : vector<16xf32> to vector<16x1xf32>
    %162 = vector.broadcast %161 : vector<16x1xf32> to vector<16x16xf32>
    %163 = arith.divf %159, %162 : vector<16x16xf32>
    %164 = arith.truncf %163 : vector<16x16xf32> to vector<16x16xbf16>
    %165 = arith.truncf %149 : vector<16x8xf32> to vector<16x8xbf16>
    %cst_44 = arith.constant dense<0.000000e+00> : vector<16x8xf32>
    %166 = tpu.matmul %164, %165, %cst_44 {dimension_numbers = #tpu.dot_dimension_numbers<[1], [0], [0], [1], [0, 0, 1, 1], [], []>} : vector<16x16xbf16>, vector<16x8xbf16>, vector<16x8xf32> -> vector<16x8xf32>
    %167 = arith.truncf %166 : vector<16x8xf32> to vector<16x8xbf16>
    %168 = vector.extract_strided_slice %3 {offsets = [24, 0], sizes = [8, 32], strides = [1, 1]} : vector<32x32xbf16> to vector<8x32xbf16>
    %cst_45 = arith.constant dense<0.000000e+00> : vector<16x32xf32>
    %169 = tpu.matmul %167, %168, %cst_45 {dimension_numbers = #tpu.dot_dimension_numbers<[1], [0], [0], [1], [0, 0, 1, 1], [], []>} : vector<16x8xbf16>, vector<8x32xbf16>, vector<16x32xf32> -> vector<16x32xf32>
    %170 = arith.addf %146, %169 : vector<16x32xf32>
    %171 = vector.broadcast %8 : vector<1x32xf32> to vector<16x32xf32>
    %172 = arith.addf %170, %171 : vector<16x32xf32>
    %173 = arith.addf %0, %172 : vector<16x32xf32>
    %cst_46 = arith.constant dense<0.000000e+00> : vector<16xf32>
    %174 = vector.multi_reduction <add>, %173, %cst_46 [1] : vector<16x32xf32> to vector<16xf32>
    %175 = vector.shape_cast %174 : vector<16xf32> to vector<16x1xf32>
    %cst_47 = arith.constant 3.200000e+01 : f32
    %176 = vector.broadcast %cst_47 : f32 to vector<16x1xf32>
    %177 = arith.divf %175, %176 : vector<16x1xf32>
    %178 = vector.broadcast %177 : vector<16x1xf32> to vector<16x32xf32>
    %179 = arith.subf %173, %178 : vector<16x32xf32>
    %180 = arith.mulf %179, %179 : vector<16x32xf32>
    %cst_48 = arith.constant dense<0.000000e+00> : vector<16xf32>
    %181 = vector.multi_reduction <add>, %180, %cst_48 [1] : vector<16x32xf32> to vector<16xf32>
    %182 = vector.shape_cast %181 : vector<16xf32> to vector<16x1xf32>
    %cst_49 = arith.constant 3.200000e+01 : f32
    %183 = vector.broadcast %cst_49 : f32 to vector<16x1xf32>
    %184 = arith.divf %182, %183 : vector<16x1xf32>
    %cst_50 = arith.constant 9.99999974E-6 : f32
    %185 = vector.broadcast %cst_50 : f32 to vector<16x1xf32>
    %186 = arith.addf %184, %185 : vector<16x1xf32>
    %187 = math.rsqrt %186 : vector<16x1xf32>
    %188 = vector.broadcast %187 : vector<16x1xf32> to vector<16x32xf32>
    %189 = arith.mulf %179, %188 : vector<16x32xf32>
    %190 = vector.broadcast %11 : vector<1x32xf32> to vector<16x32xf32>
    %191 = arith.mulf %189, %190 : vector<16x32xf32>
    %192 = vector.broadcast %12 : vector<1x32xf32> to vector<16x32xf32>
    %193 = arith.addf %191, %192 : vector<16x32xf32>
    %194 = arith.truncf %193 : vector<16x32xf32> to vector<16x32xbf16>
    %cst_51 = arith.constant dense<0.000000e+00> : vector<16x64xf32>
    %195 = tpu.matmul %194, %4, %cst_51 {dimension_numbers = #tpu.dot_dimension_numbers<[1], [0], [0], [1], [0, 0, 1, 1], [], []>} : vector<16x32xbf16>, vector<32x64xbf16>, vector<16x64xf32> -> vector<16x64xf32>
    %196 = vector.broadcast %13 : vector<1x64xf32> to vector<16x64xf32>
    %197 = arith.addf %195, %196 : vector<16x64xf32>
    %cst_52 = arith.constant 0.000000e+00 : f32
    %198 = vector.broadcast %cst_52 : f32 to vector<16x64xf32>
    %199 = arith.maximumf %197, %198 : vector<16x64xf32>
    %200 = arith.truncf %199 : vector<16x64xf32> to vector<16x64xbf16>
    %cst_53 = arith.constant dense<0.000000e+00> : vector<16x32xf32>
    %201 = tpu.matmul %200, %5, %cst_53 {dimension_numbers = #tpu.dot_dimension_numbers<[1], [0], [0], [1], [0, 0, 1, 1], [], []>} : vector<16x64xbf16>, vector<64x32xbf16>, vector<16x32xf32> -> vector<16x32xf32>
    %202 = vector.broadcast %14 : vector<1x32xf32> to vector<16x32xf32>
    %203 = arith.addf %201, %202 : vector<16x32xf32>
    %204 = arith.addf %173, %203 : vector<16x32xf32>
    %c0_54 = arith.constant 0 : index
    %c0_55 = arith.constant 0 : index
    %205 = vector.load %arg5[%c0_54, %c0_55] : memref<16x32xf32, #tpu.memory_space<vmem>>, vector<16x32xf32>
    tpu.vector_store %arg5[%c0_54, %c0_55], %204 {strides = array<i32>} : memref<16x32xf32, #tpu.memory_space<vmem>>, vector<16x32xf32>,
    return
  }
  func.func @transform_0(%arg0: i32) -> (i32, i32) {
    %c0_i32 = arith.constant 0 : i32
    %c0_i32_0 = arith.constant 0 : i32
    %c0_i32_1 = arith.constant 0 : i32
    return %c0_i32, %c0_i32_0 : i32, i32
  }
  func.func @transform_1(%arg0: i32) -> (i32, i32) {
    %c0_i32 = arith.constant 0 : i32
    %c0_i32_0 = arith.constant 0 : i32
    %c0_i32_1 = arith.constant 0 : i32
    return %c0_i32, %c0_i32_0 : i32, i32
  }
  func.func @transform_2(%arg0: i32) -> (i32, i32) {
    %c0_i32 = arith.constant 0 : i32
    %c0_i32_0 = arith.constant 0 : i32
    %c0_i32_1 = arith.constant 0 : i32
    return %c0_i32, %c0_i32_0 : i32, i32
  }
  func.func @transform_3(%arg0: i32) -> (i32, i32) {
    %c0_i32 = arith.constant 0 : i32
    %c0_i32_0 = arith.constant 0 : i32
    %c0_i32_1 = arith.constant 0 : i32
    return %c0_i32, %c0_i32_0 : i32, i32
  }
  func.func @transform_4(%arg0: i32) -> (i32, i32) {
    %c0_i32 = arith.constant 0 : i32
    %c0_i32_0 = arith.constant 0 : i32
    %c0_i32_1 = arith.constant 0 : i32
    return %c0_i32, %c0_i32_0 : i32, i32
  }
}

</mosaic_0001>

<bundles_post_ra>
// kernel: transformer_encoder_postnorm_layer.1
= control target key start
LH: loop header
LB: loop body
LE: loop exit
PB: predicated region body
PF: predicated region fallthrough
CT: control target
= control target key end

     0   :  { %vm34_vm0 = vcmask 261120   ;;  %s1646_s0 = inlined_call_operand.vmem [shape: f32[16,32], index: 0, kind: input, shape index: {}]   ;;  %s1647_s1 = inlined_call_operand.vmem [shape: bf16[32,192], index: 1, kind: input, shape index: {}]   ;;  %s1648_s2 = inlined_call_operand.vmem [shape: bf16[64,32], index: 2, kind: input, shape index: {}]   ;;  %s1649_s3 = inlined_call_operand.vmem [shape: f32[8,96], index: 3, kind: input, shape index: {}]   ;;  %s1650_s4 = inlined_call_operand.hbm [shape: f32[16,32], index: 4, kind: output, shape index: {}]  }
   0x1   :  { %v1380_v0 = vld [vmem:[%s1646_s0] sm:$0xff]  ;;  %v1385_v1 = vld [vmem:[%s1646_s0 + $0x8] sm:$0xff] }
   0x2   :  { %v35_v2 = vsel %vm34_vm0, %v1380_v0, 0.0  ;;  %v38_v3 = vsel %vm34_vm0, %v1385_v1, 0.0 }
   0x3   :  { %36 = vadd.xlane.f32.xlu0 %v35_v2 }
   0x4   :  { %9 = vsyncpa [#allocation3], 0  ;;  %v1398_v14 = vld [vmem:[%s1647_s1] sm:$0xff]  ;;  %v1403_v15 = vld [vmem:[%s1647_s1 + $0x8] sm:$0xff]  ;;  %v1335_v17 = vmov 0.0   ;;  %vm1336_vm1 = vmmov 0   ;;  %v62_v25 = vlaneseq }
   0x5   :  { %v1080_v16 = vcombine.low %v1398_v14, %v1403_v15  ;;  %1142 = vmatprep.subr.bf16.mxu1 %v1335_v17  ;;  %v1411_v18 = vld [vmem:[%s1647_s1 + $0x10] sm:$0xff]  ;;  %v1416_v19 = vld [vmem:[%s1647_s1 + $0x18] sm:$0xff]  ;;  %1156 = vmatprep.subr.bf16.mxu0 %v1335_v17  ;;  %v1433_v30 = vld [vmem:[%s1649_s3] sm:$0xff]  ;;  %s1337_s3 = smov 88   ;;  %s1338_s27 = smov 96   ;;  %vm182_vm2 = vcmask 64512  }
   0x6   :  { %v1081_v20 = vcombine.low %v1411_v18, %v1416_v19  ;;  %1146 = vmatprep.mubr.msk.bf16.mxu1 %vm1336_vm1, %v1335_v17  ;;  %1158 = vmatprep.mubr.msk.bf16.mxu0 %vm1336_vm1, %v1335_v17  ;;  %v1427_v28 = vshrl.u32 %v62_v25, 7  ;;  %s1339_s28 = smov 120   ;;  %v139_v57 = vand.u32 127, %v62_v25  ;;  %vm232_vm4 = vcmask 130048   ;;  %s1340_s29 = smov 64  }
   0x7   :  { %39 = vadd.xlane.f32.xlu0 %v38_v3  ;;  %1143 = vmatpush3.bf16.msra.mxu1 %v1080_v16  ;;  %s1341_s30 = smov 32   ;;  %s1342_s5 = smov 80   ;;  %vm434_vm6 = vcmask 1043456   ;;  %vm1015_vm7 = vcmask 523264  }
   0x8   :  { %1144 = vmatprep.subr.bf16.mxu1 %v1335_v17  ;;  %v64_v29 = vsub.s32 2, %v1427_v28  ;;  %v70_v34 = vsub.s32 3, %v1427_v28  ;;  %v77_v43 = vsub.s32 0, %v1427_v28  ;;  %v137_v58 = vadd.s32 8, %v1427_v28  ;;  %s1343_s6 = smov 56   ;;  %s1344_s7 = smov 112  }
   0x9   :  { %v144_v59 = vand.u32 1, %v1427_v28  ;;  %v168_v60 = vand.u32 1, %v139_v57  ;;  %s1345_s8 = smov 48   ;;  %s1346_s9 = smov 72  }
   0xa   :  { %v65_v33 = vrot.slane %v1433_v30, %v64_v29  ;;  %v71_v38 = vrot.slane %v1433_v30, %v70_v34  ;;  %v78_v44 = vrot.slane %v1433_v30, %v77_v43  ;;  %v151_v61 = vand.u32 1, %v137_v58  ;;  %s1347_s10 = smov 104   ;;  %s1348_s11 = smov 40  }
   0xb   :  { %1145 = vmatpush3.bf16.msra.mxu1 %v1081_v20  ;;  %vm1461_vm3 = vcmp.eq.s32.totalorder %v144_v59, %v168_v60 }
   0xc   :  { %1150 = vmatprep.subr.bf16.mxu1 %v1335_v17  ;;  %vm1465_vm5 = vcmp.eq.s32.totalorder %v151_v61, %v168_v60 }
  0x90   :  { %v37_v4 = vpop.xlane.xlu0 %36 }
  0x91   :  { %v42_v5 = vmul.f32 0.03125, %v37_v4 }
  0x93   :  { %v44_v6 = vsub.f32 %v1380_v0, %v42_v5 }
  0x94   :  { %v40_v7 = vpop.xlane.xlu0 %39 }
  0x95   :  { %v43_v8 = vmul.f32 0.03125, %v40_v7  ;;  %v46_v9 = vmul.f32 %v44_v6, %v44_v6 }
  0x97   :  { %v45_v10 = vsub.f32 %v1385_v1, %v43_v8  ;;  %v48_v11 = vsel %vm34_vm0, %v46_v9, 0.0 }
  0x98   :  { %49 = vadd.xlane.f32.xlu1 %v48_v11 }
  0x99   :  { %v47_v12 = vmul.f32 %v45_v10, %v45_v10 }
  0x9b   :  { %v51_v13 = vsel %vm34_vm0, %v47_v12, 0.0 }
  0x9c   :  { %52 = vadd.xlane.f32.xlu1 %v51_v13 }
 0x125   :  { %v50_v21 = vpop.xlane.xlu1 %49 }
 0x126   :  { %v54_v22 = vmul.f32 0.03125, %v50_v21 }
 0x128   :  { %v56_v23 = vadd.f32 1e-05, %v54_v22 }
 0x129   :  { %v53_v24 = vpop.xlane.xlu1 %52 }
 0x12a   :  { %1271 = vrsqrt.f32 %v56_v23  ;;  %v55_v26 = vmul.f32 0.03125, %v53_v24 }
 0x12c   :  { %v57_v27 = vadd.f32 1e-05, %v55_v26 }
 0x12e   :  { %1273 = vrsqrt.f32 %v57_v27 }
 0x134   :  { %v1272_v31 = vpop.eup %1271 }
 0x135   :  { %v60_v32 = vmul.f32 %v1272_v31, %v44_v6 }
 0x137   :  { %v66_v37 = vmul.f32 %v65_v33, %v60_v32 }
 0x138   :  { %v1274_v35 = vpop.eup %1273 }
 0x139   :  { %v61_v36 = vmul.f32 %v1274_v35, %v45_v10  ;;  %v72_v40 = vadd.f32 %v71_v38, %v66_v37 }
 0x13b   :  { %v67_v39 = vmul.f32 %v65_v33, %v61_v36 }
 0x13d   :  { %v73_v41 = vadd.f32 %v71_v38, %v67_v39 }
 0x13f   :  { %v74_v42 = vpack.c.bf16 %v73_v41, %v72_v40 }
 0x141   :  { %1147 = vmatmul.mubr.msk.bf16.vlgmr.msra.gmra.mrb[0].mxu1 %vm34_vm0, %v74_v42 }
 0x142   :  { %1152 = vmatprep.mubr.msk.bf16.mxu1 %vm1336_vm1, %v1335_v17 }
 0x214   :  { %v128_v45 = vpop.f32.mrb[0].mxu1 }
 0x215   :  { %v1148_v46 = vpop.f32.mrb[1].mxu1  ;;  %v129_v48 = vadd.f32 %v128_v45, %v78_v44  ;;  %v1087_v45 = vcombine.low %v1403_v15, %v1403_v15 }
 0x216   :  { %v131_v47 = vpop.f32.mrb[2].mxu1 }
 0x217   :  { %v132_v49 = vadd.f32 %v131_v47, %v78_v44  ;;  %v1149_v50 = vpop.f32.mrb[3].mxu1 }
 0x219   :  { %v1443_v51 = vpack.c.bf16 %v132_v49, %v129_v48 }
 0x21b   :  { %306 = vrot.lane.b32.xlu1 %v1443_v51, %s1337_s3  ;;  %180 = vrot.lane.b32.xlu0 %v1443_v51, %s1338_s27 }
 0x21f   :  { %304 = vrot.lane.b32.xlu1 %v1443_v51, %s1339_s28 }
 0x28d   :  { %v181_v52 = vpop.permute.xlu0 %180  ;;  %v307_v54 = vpop.permute.xlu1 %306 }
 0x28e   :  { %v187_v53 = vsel %vm182_vm2, %v181_v52, 0  ;;  %v312_v55 = vsel %vm182_vm2, %v307_v54, 0 }
 0x28f   :  { %1151 = vmatpush3.bf16.xpose.msra.mxu1 %v187_v53 }
 0x290   :  { %1162 = vmatprep.subr.bf16.mxu1 %v1335_v17 }
 0x291   :  { %v305_v56 = vpop.permute.xlu1 %304 }
 0x296   :  { %1153 = vmatmul.mubr.msk.bf16.vlgmr.msra.gmra.mrb[4].mxu1 %vm182_vm2, %v1443_v51 }
 0x297   :  { %1163 = vmatpush3.bf16.xpose.msra.mxu1 %v312_v55  ;;  %1164 = vmatprep.mubr.msk.bf16.mxu1 %vm1336_vm1, %v1335_v17 }
 0x298   :  { %1174 = vmatprep.subr.bf16.mxu1 %v1335_v17 }
 0x29e   :  { %1165 = vmatmul.mubr.msk.bf16.vlgmr.msra.gmra.mrb[8].mxu1 %vm182_vm2, %v305_v56 }
 0x29f   :  { %1176 = vmatprep.mubr.msk.bf16.mxu1 %vm1336_vm1, %v1335_v17 }
 0x369   :  { %v223_v63 = vpop.f32.mrb[4].mxu1 }
 0x36a   :  { %v230_v3 = vsel %vm1461_vm3, %v223_v63, -1e+30  ;;  %v1154_v4 = vpop.f32.mrb[5].mxu1 }
 0x36b   :  { %v226_v5 = vpop.f32.mrb[6].mxu1  ;;  %v233_v6 = vsel %vm232_vm4, %v230_v3, -inf }
 0x36c   :  { %v231_v7 = vsel %vm1465_vm5, %v226_v5, -1e+30  ;;  %234 = vmax.xlane.f32.xlu1 %v233_v6  ;;  %v1155_v8 = vpop.f32.mrb[7].mxu1 }
 0x36d   :  { %v236_v9 = vsel %vm232_vm4, %v231_v7, -inf }
 0x36e   :  { %237 = vmax.xlane.f32.xlu0 %v236_v9 }
 0x371   :  { %v348_v10 = vpop.f32.mrb[8].mxu1 }
 0x372   :  { %v355_v11 = vsel %vm1461_vm3, %v348_v10, -1e+30  ;;  %v1166_v12 = vpop.f32.mrb[9].mxu1 }
 0x373   :  { %v351_v13 = vpop.f32.mrb[10].mxu1  ;;  %v357_v16 = vsel %vm232_vm4, %v355_v11, -inf }
 0x374   :  { %v356_v20 = vsel %vm1465_vm5, %v351_v13, -1e+30  ;;  %358 = vmax.xlane.f32.xlu0 %v357_v16  ;;  %v1167_v21 = vpop.f32.mrb[11].mxu1 }
 0x375   :  { %v360_v22 = vsel %vm232_vm4, %v356_v20, -inf }
 0x378   :  { %361 = vmax.xlane.f32.xlu0 %v360_v22 }
 0x3f9   :  { %v235_v23 = vpop.xlane.xlu1 %234 }
 0x3fa   :  { %v239_v24 = vsub.f32 %v230_v3, %v235_v23 }
 0x3fb   :  { %v238_v25 = vpop.xlane.xlu0 %237 }
 0x3fc   :  { %v241_v26 = vmul.f32 1.442695, %v239_v24  ;;  %v240_v27 = vsub.f32 %v231_v7, %v238_v25 }
 0x3fe   :  { %1275 = vpow2.f32 %v241_v26  ;;  %v243_v29 = vmul.f32 1.442695, %v240_v27 }
 0x400   :  { %1277 = vpow2.f32 %v243_v29 }
 0x401   :  { %v359_v31 = vpop.xlane.xlu0 %358 }
 0x402   :  { %v363_v32 = vsub.f32 %v355_v11, %v359_v31 }
 0x404   :  { %v365_v33 = vmul.f32 1.442695, %v363_v32 }
 0x405   :  { %v362_v34 = vpop.xlane.xlu0 %361 }
 0x406   :  { %1279 = vpow2.f32 %v365_v33  ;;  %v364_v35 = vsub.f32 %v356_v20, %v362_v34 }
 0x408   :  { %v1276_v36 = vpop.eup %1275  ;;  %v367_v37 = vmul.f32 1.442695, %v364_v35 }
 0x409   :  { %v245_v38 = vsel %vm232_vm4, %v1276_v36, 0.0 }
 0x40a   :  { %v1278_v39 = vpop.eup %1277  ;;  %1281 = vpow2.f32 %v367_v37  ;;  %246 = vadd.xlane.f32.xlu1 %v245_v38 }
 0x40b   :  { %v248_v40 = vsel %vm232_vm4, %v1278_v39, 0.0 }
 0x40c   :  { %249 = vadd.xlane.f32.xlu0 %v248_v40 }
 0x410   :  { %v1280_v41 = vpop.eup %1279 }
 0x411   :  { %v369_v42 = vsel %vm232_vm4, %v1280_v41, 0.0 }
 0x412   :  { %370 = vadd.xlane.f32.xlu1 %v369_v42 }
 0x414   :  { %v1282_v43 = vpop.eup %1281 }
 0x415   :  { %v372_v44 = vsel %vm232_vm4, %v1282_v43, 0.0 }
 0x416   :  { %373 = vadd.xlane.f32.xlu0 %v372_v44 }
 0x423   :  { %256 = vrot.lane.b32.xlu1 %v1443_v51, %s1340_s29 }
 0x427   :  { %429 = vrot.lane.b32.xlu1 %v1087_v45, %s1341_s30 }
 0x42b   :  { %531 = vrot.lane.b32.xlu1 %v1443_v51, %s1342_s5 }
 0x42c   :  { %380 = vrot.lane.b32.xlu0 %v1443_v51, %s1343_s6 }
 0x42f   :  { %529 = vrot.lane.b32.xlu1 %v1443_v51, %s1344_s7 }
 0x497   :  { %v247_v46 = vpop.xlane.xlu1 %246 }
 0x498   :  { %1283 = vrcp.f32 %v247_v46 }
 0x499   :  { %v250_v47 = vpop.xlane.xlu0 %249 }
 0x49a   :  { %1285 = vrcp.f32 %v250_v47  ;;  %v1089_v47 = vcombine.low %v1398_v14, %v1398_v14 }
 0x49f   :  { %v371_v48 = vpop.xlane.xlu1 %370 }
 0x4a0   :  { %1287 = vrcp.f32 %v371_v48 }
 0x4a2   :  { %v1284_v49 = vpop.eup %1283 }
 0x4a3   :  { %v257_v50 = vpop.permute.xlu1 %256  ;;  %v374_v52 = vpop.xlane.xlu0 %373  ;;  %v252_v54 = vmul.f32 %v1284_v49, %v1276_v36 }
 0x4a4   :  { %v1286_v53 = vpop.eup %1285  ;;  %1289 = vrcp.f32 %v374_v52  ;;  %1157 = vmatpush3.bf16.msra.mxu0 %v257_v50 }
 0x4a5   :  { %1168 = vmatprep.subr.bf16.mxu0 %v1335_v17  ;;  %v254_v55 = vmul.f32 %v1286_v53, %v1278_v39 }
 0x4a7   :  { %v430_v56 = vpop.permute.xlu1 %429  ;;  %v381_v57 = vpop.permute.xlu0 %380  ;;  %v255_v58 = vpack.c.bf16 %v254_v55, %v252_v54 }
 0x4a8   :  { %v436_v59 = vsel %vm434_vm6, %v430_v56, 0 }
 0x4a9   :  { %1159 = vmatmul.mubr.msk.bf16.vlgmr.msra.gmra.mrb[0].mxu0 %vm232_vm4, %v255_v58  ;;  %1175 = vmatpush3.bf16.msra.mxu1 %v436_v59 }
 0x4aa   :  { %1169 = vmatpush3.bf16.msra.mxu0 %v381_v57  ;;  %1170 = vmatprep.mubr.msk.bf16.mxu0 %vm1336_vm1, %v1335_v17  ;;  %v1288_v60 = vpop.eup %1287 }
 0x4ab   :  { %1186 = vmatprep.subr.bf16.mxu1 %v1335_v17  ;;  %1180 = vmatprep.subr.bf16.mxu0 %v1335_v17  ;;  %v376_v63 = vmul.f32 %v1288_v60, %v1280_v41  ;;  %v532_v12 = vpop.permute.xlu1 %531 }
 0x4ac   :  { %v537_v21 = vsel %vm182_vm2, %v532_v12, 0 }
 0x4ae   :  { %v1290_v61 = vpop.eup %1289 }
 0x4af   :  { %v378_v3 = vmul.f32 %v1290_v61, %v1282_v43  ;;  %v530_v22 = vpop.permute.xlu1 %529 }
 0x4b1   :  { %v379_v4 = vpack.c.bf16 %v378_v3, %v376_v63 }
 0x4b3   :  { %1171 = vmatmul.mubr.msk.bf16.vlgmr.msra.gmra.mrb[4].mxu0 %vm232_vm4, %v379_v4 }
 0x4b4   :  { %1182 = vmatprep.mubr.msk.bf16.mxu0 %vm1336_vm1, %v1335_v17 }
 0x57c   :  { %v1502_v5 = vpop.f32.mrb[0].mxu0 }
 0x57d   :  { %v1160_v6 = vpop.f32.mrb[1].mxu0 }
 0x57e   :  { %v1504_v7 = vpop.f32.mrb[2].mxu0 }
 0x57f   :  { %v303_v8 = vpack.c.bf16 %v1504_v7, %v1502_v5  ;;  %v1161_v9 = vpop.f32.mrb[3].mxu0 }
 0x586   :  { %v420_v10 = vpop.f32.mrb[4].mxu0 }
 0x587   :  { %v1172_v11 = vpop.f32.mrb[5].mxu0 }
 0x588   :  { %v423_v13 = vpop.f32.mrb[6].mxu0 }
 0x589   :  { %v427_v16 = vpack.c.bf16 %v423_v13, %v420_v10  ;;  %v1173_v20 = vpop.f32.mrb[7].mxu0 }
 0x58b   :  { %1177 = vmatmul.mubr.msk.bf16.vlgmr.msra.gmra.mrb[12].mxu1 %vm182_vm2, %v427_v16 }
 0x58c   :  { %1187 = vmatpush3.bf16.xpose.msra.mxu1 %v537_v21  ;;  %1188 = vmatprep.mubr.msk.bf16.mxu1 %vm1336_vm1, %v1335_v17 }
 0x58d   :  { %1198 = vmatprep.subr.bf16.mxu1 %v1335_v17 }
 0x593   :  { %1189 = vmatmul.mubr.msk.bf16.vlgmr.msra.gmra.mrb[16].mxu1 %vm182_vm2, %v530_v22 }
 0x594   :  { %1200 = vmatprep.mubr.msk.bf16.mxu1 %vm1336_vm1, %v1335_v17 }
 0x65e   :  { %v1516_v23 = vpop.f32.mrb[12].mxu1 }
 0x65f   :  { %v1178_v24 = vpop.f32.mrb[13].mxu1 }
 0x660   :  { %v1518_v25 = vpop.f32.mrb[14].mxu1 }
 0x661   :  { %v1179_v26 = vpop.f32.mrb[15].mxu1 }
 0x666   :  { %v573_v27 = vpop.f32.mrb[16].mxu1 }
 0x667   :  { %v580_v29 = vsel %vm1461_vm3, %v573_v27, -1e+30  ;;  %v1190_v31 = vpop.f32.mrb[17].mxu1 }
 0x668   :  { %v576_v32 = vpop.f32.mrb[18].mxu1  ;;  %v582_v33 = vsel %vm232_vm4, %v580_v29, -inf }
 0x669   :  { %v581_v34 = vsel %vm1465_vm5, %v576_v32, -1e+30  ;;  %583 = vmax.xlane.f32.xlu0 %v582_v33  ;;  %v1191_v35 = vpop.f32.mrb[19].mxu1 }
 0x66a   :  { %v585_v36 = vsel %vm232_vm4, %v581_v34, -inf }
 0x66b   :  { %586 = vmax.xlane.f32.xlu1 %v585_v36  ;;  %v1093_v36 = vcombine.low %v1411_v18, %v1411_v18 }
 0x67c   :  { %605 = vrot.lane.b32.xlu1 %v1443_v51, %s1345_s8 }
 0x680   :  { %707 = vrot.lane.b32.xlu1 %v1443_v51, %s1346_s9 }
 0x684   :  { %705 = vrot.lane.b32.xlu1 %v1443_v51, %s1347_s10 }
 0x6f6   :  { %v584_v37 = vpop.xlane.xlu0 %583 }
 0x6f7   :  { %v588_v38 = vsub.f32 %v580_v29, %v584_v37 }
 0x6f8   :  { %v587_v39 = vpop.xlane.xlu1 %586 }
 0x6f9   :  { %v590_v40 = vmul.f32 1.442695, %v588_v38  ;;  %v589_v41 = vsub.f32 %v581_v34, %v587_v39 }
 0x6fb   :  { %1291 = vpow2.f32 %v590_v40  ;;  %v592_v42 = vmul.f32 1.442695, %v589_v41 }
 0x6fc   :  { %v606_v54 = vpop.permute.xlu1 %605 }
 0x6fd   :  { %1293 = vpow2.f32 %v592_v42 }
 0x700   :  { %v708_v59 = vpop.permute.xlu1 %707 }
 0x701   :  { %v713_v60 = vsel %vm182_vm2, %v708_v59, 0 }
 0x704   :  { %v706_v61 = vpop.permute.xlu1 %705 }
 0x705   :  { %v1292_v43 = vpop.eup %1291 }
 0x706   :  { %v594_v44 = vsel %vm232_vm4, %v1292_v43, 0.0 }
 0x707   :  { %v1294_v45 = vpop.eup %1293  ;;  %595 = vadd.xlane.f32.xlu0 %v594_v44 }
 0x708   :  { %v597_v46 = vsel %vm232_vm4, %v1294_v45, 0.0 }
 0x70b   :  { %598 = vadd.xlane.f32.xlu0 %v597_v46  ;;  %v1099_v46 = vcombine.high %v1398_v14, %v1403_v15 }
 0x721   :  { %480 = vrot.lane.b32.xlu0 %v1089_v47, %s1341_s30 }
 0x794   :  { %v596_v48 = vpop.xlane.xlu0 %595 }
 0x795   :  { %1295 = vrcp.f32 %v596_v48 }
 0x798   :  { %v599_v49 = vpop.xlane.xlu0 %598 }
 0x799   :  { %1297 = vrcp.f32 %v599_v49 }
 0x79c   :  { %v481_v50 = vpop.permute.xlu0 %480 }
 0x79d   :  { %v486_v52 = vsel %vm434_vm6, %v481_v50, 0 }
 0x79e   :  { %1181 = vmatpush3.bf16.msra.mxu0 %v486_v52 }
 0x79f   :  { %1192 = vmatprep.subr.bf16.mxu0 %v1335_v17  ;;  %v1296_v53 = vpop.eup %1295 }
 0x7a0   :  { %v601_v56 = vmul.f32 %v1296_v53, %v1292_v43 }
 0x7a1   :  { %1183 = vmatmul.mubr.msk.bf16.vlgmr.msra.gmra.mrb[8].mxu0 %vm182_vm2, %v303_v8 }
 0x7a2   :  { %1193 = vmatpush3.bf16.msra.mxu0 %v606_v54  ;;  %1194 = vmatprep.mubr.msk.bf16.mxu0 %vm1336_vm1, %v1335_v17 }
 0x7a3   :  { %v1298_v55 = vpop.eup %1297  ;;  %1204 = vmatprep.subr.bf16.mxu0 %v1335_v17 }
 0x7a4   :  { %v603_v57 = vmul.f32 %v1298_v55, %v1294_v45 }
 0x7a6   :  { %v604_v58 = vpack.c.bf16 %v603_v57, %v601_v56 }
 0x7a9   :  { %1195 = vmatmul.mubr.msk.bf16.vlgmr.msra.gmra.mrb[12].mxu0 %vm232_vm4, %v604_v58 }
 0x7aa   :  { %1206 = vmatprep.mubr.msk.bf16.mxu0 %vm1336_vm1, %v1335_v17 }
 0x7ab   :  { %1205 = vmatpush3.bf16.xpose.msra.mxu0 %v713_v60  ;;  %v883_v60 = vsub.s32 1, %v1427_v28 }
 0x7ac   :  { %1216 = vmatprep.subr.bf16.mxu0 %v1335_v17 }
 0x7b2   :  { %1207 = vmatmul.mubr.msk.bf16.vlgmr.msra.gmra.mrb[16].mxu0 %vm182_vm2, %v706_v61  ;;  %v884_v61 = vrot.slane %v1433_v30, %v883_v60 }
 0x7b3   :  { %1218 = vmatprep.mubr.msk.bf16.mxu0 %vm1336_vm1, %v1335_v17 }
 0x874   :  { %v522_v63 = vpop.f32.mrb[8].mxu0 }
 0x875   :  { %v1549_v3 = vadd.f32 %v522_v63, %v1516_v23  ;;  %v1184_v4 = vpop.f32.mrb[9].mxu0 }
 0x876   :  { %v525_v5 = vpop.f32.mrb[10].mxu0 }
 0x877   :  { %v1552_v6 = vadd.f32 %v525_v5, %v1518_v25  ;;  %v1185_v7 = vpop.f32.mrb[11].mxu0 }
 0x87c   :  { %v645_v8 = vpop.f32.mrb[12].mxu0 }
 0x87d   :  { %v1196_v9 = vpop.f32.mrb[13].mxu0 }
 0x87e   :  { %v648_v10 = vpop.f32.mrb[14].mxu0 }
 0x87f   :  { %v652_v11 = vpack.c.bf16 %v648_v10, %v645_v8  ;;  %v1197_v12 = vpop.f32.mrb[15].mxu0 }
 0x885   :  { %v749_v13 = vpop.f32.mrb[16].mxu0 }
 0x886   :  { %v756_v16 = vsel %vm1461_vm3, %v749_v13, -1e+30  ;;  %v1208_v20 = vpop.f32.mrb[17].mxu0 }
 0x887   :  { %v752_v21 = vpop.f32.mrb[18].mxu0  ;;  %v758_v22 = vsel %vm232_vm4, %v756_v16, -inf }
 0x888   :  { %v757_v23 = vsel %vm1465_vm5, %v752_v21, -1e+30  ;;  %759 = vmax.xlane.f32.xlu0 %v758_v22  ;;  %v1209_v24 = vpop.f32.mrb[19].mxu0 }
 0x889   :  { %v761_v25 = vsel %vm232_vm4, %v757_v23, -inf }
 0x88a   :  { %762 = vmax.xlane.f32.xlu1 %v761_v25 }
 0x89b   :  { %781 = vrot.lane.b32.xlu1 %v1443_v51, %s1348_s11  ;;  %v1097_v51 = vcombine.low %v1416_v19, %v1416_v19 }
 0x89f   :  { %830 = vrot.lane.b32.xlu1 %v1097_v51, %s1341_s30 }
 0x915   :  { %v760_v26 = vpop.xlane.xlu0 %759 }
 0x916   :  { %v764_v27 = vsub.f32 %v756_v16, %v760_v26 }
 0x917   :  { %v763_v29 = vpop.xlane.xlu1 %762 }
 0x918   :  { %v766_v62 = vmul.f32 1.442695, %v764_v27  ;;  %v765_v31 = vsub.f32 %v757_v23, %v763_v29  ;;  %v1100_v27 = vcombine.high %v1411_v18, %v1416_v19  ;;  %v1267_v29 = vld [vmem:[%s1648_s2] sm:$0xff]  }
 0x91a   :  { %1299 = vpow2.f32 %v766_v62  ;;  %v768_v32 = vmul.f32 1.442695, %v765_v31  ;;  %v1268_v62 = vld [vmem:[%s1648_s2 + $0x8] sm:$0xff]  }
 0x91b   :  { %v782_v42 = vpop.permute.xlu1 %781 }
 0x91c   :  { %1301 = vpow2.f32 %v768_v32 }
 0x91f   :  { %v831_v48 = vpop.permute.xlu1 %830 }
 0x920   :  { %v836_v49 = vsel %vm434_vm6, %v831_v48, 0  ;;  %v930_v48 = vsub.s32 6, %v1427_v28 }
 0x921   :  { %1217 = vmatpush3.bf16.msra.mxu0 %v836_v49 }
 0x922   :  { %1230 = vmatprep.subr.bf16.mxu0 %v1335_v17  ;;  %v931_v49 = vrot.slane %v1433_v30, %v930_v48 }
 0x924   :  { %v1300_v33 = vpop.eup %1299 }
 0x925   :  { %v770_v2 = vsel %vm232_vm4, %v1300_v33, 0.0 }
 0x926   :  { %v1302_v34 = vpop.eup %1301  ;;  %771 = vadd.xlane.f32.xlu0 %v770_v2 }
 0x927   :  { %v773_v35 = vsel %vm232_vm4, %v1302_v34, 0.0 }
 0x92a   :  { %774 = vadd.xlane.f32.xlu0 %v773_v35 }
 0x940   :  { %654 = vrot.lane.b32.xlu0 %v1093_v36, %s1341_s30 }
 0x9b3   :  { %v772_v37 = vpop.xlane.xlu0 %771 }
 0x9b4   :  { %1303 = vrcp.f32 %v772_v37  ;;  %v923_v37 = vsub.s32 5, %v1427_v28 }
 0x9b7   :  { %v775_v38 = vpop.xlane.xlu0 %774 }
 0x9b8   :  { %1305 = vrcp.f32 %v775_v38 }
 0x9bb   :  { %v655_v39 = vpop.permute.xlu0 %654 }
 0x9bc   :  { %v660_v40 = vsel %vm434_vm6, %v655_v39, 0 }
 0x9bd   :  { %1199 = vmatpush3.bf16.msra.mxu1 %v660_v40 }
 0x9be   :  { %1210 = vmatprep.subr.bf16.mxu1 %v1335_v17  ;;  %v1304_v41 = vpop.eup %1303 }
 0x9bf   :  { %v777_v44 = vmul.f32 %v1304_v41, %v1300_v33  ;;  %v924_v41 = vrot.slane %v1433_v30, %v923_v37 }
 0x9c0   :  { %1201 = vmatmul.mubr.msk.bf16.vlgmr.msra.gmra.mrb[20].mxu1 %vm182_vm2, %v652_v11 }
 0x9c1   :  { %1211 = vmatpush3.bf16.msra.mxu1 %v782_v42  ;;  %1212 = vmatprep.mubr.msk.bf16.mxu1 %vm1336_vm1, %v1335_v17 }
 0x9c2   :  { %v1306_v43 = vpop.eup %1305  ;;  %1222 = vmatprep.subr.bf16.mxu1 %v1335_v17 }
 0x9c3   :  { %v779_v45 = vmul.f32 %v1306_v43, %v1302_v34  ;;  %v917_v34 = vsub.s32 4, %v1427_v28 }
 0x9c5   :  { %v780_v47 = vpack.c.bf16 %v779_v45, %v777_v44  ;;  %v918_v36 = vrot.slane %v1433_v30, %v917_v34 }
 0x9c8   :  { %1213 = vmatmul.mubr.msk.bf16.vlgmr.msra.gmra.mrb[24].mxu1 %vm232_vm4, %v780_v47  ;;  %v1270_v47 = vld [vmem:[%s1648_s2 + $0x18] sm:$0xff]  }
 0x9c9   :  { %1223 = vmatpush3.bf16.msra.mxu1 %v1099_v46  ;;  %1226 = vmatprep.mubr.msk.bf16.mxu1 %vm1336_vm1, %v1335_v17  ;;  %v1269_v46 = vld [vmem:[%s1648_s2 + $0x10] sm:$0xff]   ;;  %s1349_s2 = smov [#allocation2]  }
 0x9ca   :  { %1224 = vmatprep.subr.bf16.mxu1 %v1335_v17  ;;  %s1069_s19 = sshll.u32 %s1349_s2, 4  ;;  %s1070_s19 = int_to_ptr.vmem [resolvable:$true] %s1069_s19 }
 0x9cb   :  { %s1311_s20 = scalar_lea.vmem %s1070_s19, 256  ;;  %p1316_p1 = scmp.lt.s32.totalorder %s1070_s19, %s1070_s19 }
 0x9cc   :  { %p1312_p0 = scmp.ne.s32.totalorder %s1070_s19, %s1311_s20  ;;  %p1317_p2 = scmp.lt.s32.totalorder %s1311_s20, %s1311_s20 }
 0x9cd   :  { %1225 = vmatpush3.bf16.msra.mxu1 %v1100_v27 }
 0x9ce   :  { %p1318_p3 = por %p1317_p2, %p1316_p1 }
 0x9d0   :  { %p1319_p4 = pnand %p1318_p3, %p1312_p0 }
 0xa93   :  { %v696_v50 = vpop.f32.mrb[20].mxu1 }
 0xa94   :  { %v703_v52 = vadd.f32 %v696_v50, %v1549_v3  ;;  %v1202_v53 = vpop.f32.mrb[21].mxu1 }
 0xa95   :  { %v699_v14 = vpop.f32.mrb[22].mxu1 }
 0xa96   :  { %v704_v15 = vadd.f32 %v699_v14, %v1552_v6  ;;  %v1203_v54 = vpop.f32.mrb[23].mxu1 }
 0xa9b   :  { %v821_v55 = vpop.f32.mrb[24].mxu1 }
 0xa9c   :  { %v1214_v56 = vpop.f32.mrb[25].mxu1 }
 0xa9d   :  { %v824_v57 = vpop.f32.mrb[26].mxu1 }
 0xa9e   :  { %v828_v58 = vpack.c.bf16 %v824_v57, %v821_v55  ;;  %v1215_v59 = vpop.f32.mrb[27].mxu1 }
 0xaa0   :  { %1219 = vmatmul.mubr.msk.bf16.vlgmr.msra.gmra.mrb[20].mxu0 %vm182_vm2, %v828_v58 }
 0xaa1   :  { %1238 = vmatprep.mubr.msk.bf16.mxu0 %vm1336_vm1, %v1335_v17  ;;  %1231 = vmatpush3.bf16.msra.mxu0 %v1267_v29 }
 0xaa2   :  { %1232 = vmatprep.subr.bf16.mxu0 %v1335_v17 }
 0xaa5   :  { %1233 = vmatpush3.bf16.msra.mxu0 %v1268_v62 }
 0xaa6   :  { %1234 = vmatprep.subr.bf16.mxu0 %v1335_v17 }
 0xaa9   :  { %1235 = vmatpush3.bf16.msra.mxu0 %v1269_v46 }
 0xaaa   :  { %1236 = vmatprep.subr.bf16.mxu0 %v1335_v17  ;;  %v989_v17 = vsub.s32 7, %v1427_v28 }
 0xaac   :  { %v990_v58 = vrot.slane %v1433_v30, %v989_v17 }
 0xaad   :  { %1237 = vmatpush3.bf16.msra.mxu0 %v1270_v47 }
 0xb73   :  { %v872_v63 = vpop.f32.mrb[20].mxu0 }
 0xb74   :  { %v879_v3 = vadd.f32 %v872_v63, %v703_v52  ;;  %v1220_v4 = vpop.f32.mrb[21].mxu0 }
 0xb75   :  { %v875_v5 = vpop.f32.mrb[22].mxu0 }
 0xb76   :  { %v885_v6 = vadd.f32 %v884_v61, %v879_v3  ;;  %v880_v7 = vadd.f32 %v875_v5, %v704_v15  ;;  %v1221_v8 = vpop.f32.mrb[23].mxu0 }
 0xb78   :  { %v1591_v9 = vadd.f32 %v885_v6, %v1380_v0  ;;  %v886_v10 = vadd.f32 %v884_v61, %v880_v7 }
 0xb7a   :  { %v1594_v11 = vadd.f32 %v886_v10, %v1385_v1  ;;  %v889_v12 = vsel %vm34_vm0, %v1591_v9, 0.0 }
 0xb7b   :  { %890 = vadd.xlane.f32.xlu1 %v889_v12 }
 0xb7c   :  { %v892_v13 = vsel %vm34_vm0, %v1594_v11, 0.0 }
 0xb7d   :  { %893 = vadd.xlane.f32.xlu0 %v892_v13 }
 0xc08   :  { %v891_v16 = vpop.xlane.xlu1 %890 }
 0xc09   :  { %v895_v20 = vmul.f32 0.03125, %v891_v16 }
 0xc0a   :  { %v894_v21 = vpop.xlane.xlu0 %893 }
 0xc0b   :  { %v897_v22 = vsub.f32 %v1591_v9, %v895_v20  ;;  %v896_v23 = vmul.f32 0.03125, %v894_v21 }
 0xc0d   :  { %v898_v0 = vsub.f32 %v1594_v11, %v896_v23  ;;  %v899_v24 = vmul.f32 %v897_v22, %v897_v22 }
 0xc0f   :  { %v901_v1 = vsel %vm34_vm0, %v899_v24, 0.0  ;;  %v900_v25 = vmul.f32 %v898_v0, %v898_v0 }
 0xc10   :  { %902 = vadd.xlane.f32.xlu0 %v901_v1 }
 0xc11   :  { %v904_v26 = vsel %vm34_vm0, %v900_v25, 0.0 }
 0xc14   :  { %905 = vadd.xlane.f32.xlu0 %v904_v26 }
 0xc9d   :  { %v903_v31 = vpop.xlane.xlu0 %902 }
 0xc9e   :  { %v907_v32 = vmul.f32 0.03125, %v903_v31 }
 0xca0   :  { %v909_v33 = vadd.f32 1e-05, %v907_v32 }
 0xca1   :  { %v906_v2 = vpop.xlane.xlu0 %905 }
 0xca2   :  { %1307 = vrsqrt.f32 %v909_v33  ;;  %v908_v18 = vmul.f32 0.03125, %v906_v2 }
 0xca4   :  { %v910_v19 = vadd.f32 1e-05, %v908_v18 }
 0xca6   :  { %1309 = vrsqrt.f32 %v910_v19 }
 0xcac   :  { %v1308_v35 = vpop.eup %1307 }
 0xcad   :  { %v913_v51 = vmul.f32 %v1308_v35, %v897_v22 }
 0xcaf   :  { %v919_v39 = vmul.f32 %v918_v36, %v913_v51 }
 0xcb0   :  { %v1310_v38 = vpop.eup %1309 }
 0xcb1   :  { %v914_v40 = vmul.f32 %v1310_v38, %v898_v0  ;;  %v925_v43 = vadd.f32 %v924_v41, %v919_v39 }
 0xcb3   :  { %v920_v42 = vmul.f32 %v918_v36, %v914_v40 }
 0xcb5   :  { %v926_v44 = vadd.f32 %v924_v41, %v920_v42 }
 0xcb7   :  { %v927_v45 = vpack.c.bf16 %v926_v44, %v925_v43 }
 0xcb9   :  { %1227 = vmatmul.mubr.msk.bf16.vlgmr.msra.gmra.mrb[28].mxu1 %vm34_vm0, %v927_v45 }
 0xd8c   :  { %v977_v50 = vpop.f32.mrb[28].mxu1 }
 0xd8d   :  { %v978_v52 = vadd.f32 %v977_v50, %v931_v49  ;;  %v1228_v53 = vpop.f32.mrb[29].mxu1 }
 0xd8e   :  { %v980_v14 = vpop.f32.mrb[30].mxu1 }
 0xd8f   :  { %v981_v15 = vadd.f32 %v980_v14, %v931_v49  ;;  %v1229_v54 = vpop.f32.mrb[31].mxu1  ;;  %v984_v55 = vmax.f32 %v978_v52, 0.0 }
 0xd91   :  { %v985_v56 = vmax.f32 %v981_v15, 0.0 }
 0xd93   :  { %v986_v57 = vpack.c.bf16 %v985_v56, %v984_v55 }
 0xd95   :  { %1239 = vmatmul.mubr.msk.bf16.vlgmr.msra.gmra.mrb[24].mxu0 %vm1015_vm7, %v986_v57 }
 0xe68   :  { %v1053_v59 = vpop.f32.mrb[24].mxu0 }
 0xe69   :  { %v1054_v60 = vadd.f32 %v1053_v59, %v990_v58  ;;  %v1240_v61 = vpop.f32.mrb[25].mxu0 }
 0xe6a   :  { %v1056_v63 = vpop.f32.mrb[26].mxu0 }
 0xe6b   :  { %v1060_v3 = vadd.f32 %v1054_v60, %v1591_v9  ;;  %v1057_v4 = vadd.f32 %v1056_v63, %v990_v58  ;;  %v1241_v5 = vpop.f32.mrb[27].mxu0 }
 0xe6d   :  { %1062 = vst.msk [vmem:[#allocation2] sm:$0xff] %vm34_vm0, %v1060_v3  ;;  %v1061_v6 = vadd.f32 %v1057_v4, %v1594_v11 }
 0xe6f   :  { %1063 = vst.msk [vmem:[#allocation2 + $0x8] sm:$0xff] %vm34_vm0, %v1061_v6 }
 0xe70   :  { %1322 = shalt.err (!%p1319_p4)
}
 0xe71   :  { %s1323_s23 = scalar_lea.hbm %s1650_s4, 256 }
 0xe72   :  { %p1324_p5 = scmp.ne.s32.totalorder %s1650_s4, %s1323_s23  ;;  %p1327_p6 = scmp.lt.u32.totalorder %s1323_s23, %s1650_s4 }
 0xe74   :  { %p1329_p7 = pnand %p1327_p6, %p1324_p5 }
 0xe76   :  { %1332 = shalt.err (!%p1329_p7)
}
 0xe77   :  { %s1350_s3 = smov 128   ;;  %s1351_s27 = smov 8  }
 0xe78   :  { %1075 = dma.vmem_to_hbm [thread:$0]  %s1070_s19, 256, %s1650_s4, [#allocation3], %s1350_s3, %s1350_s3, %s1351_s27  }
 0xe79   :  { %1333 = dma.done.wait [#allocation3], 256  }
 0xe7a   :  { %1334 = vsyncadd [#allocation3], 4294967040 }
 0xe7b   :  { %1079 = vsyncpa [#allocation3], 1 }

</bundles_post_ra>
